<compile_context>
chip_gen: v5e
topology: v5e:2x2
jax: 0.10.0
libtpu: 0.0.40
codegen_flags: <defaults>
</compile_context>

<pallas_src>
import numpy as np
import jax
import jax.numpy as jnp
from jax.experimental import pallas as pl
from jax.experimental.pallas import tpu as pltpu


# Padded tile sizes (lane-dense last dim, sublane-dense second-to-last dim).
N_PAD = 8        # node rows (f32 sublane minimum; real N = 4)
F_PAD = 128      # feature / hidden / output channel width (lane dim)
B_PAD = 8        # pooled-graph rows (sublane minimum)
SLAB_ROWS = 16   # packed small-operand slab rows (two f32 (8,128) tiles)

# Slab layout (f32, shape (SLAB_ROWS, F_PAD)):
#   rows 0..N_PAD-1 : Ae[n] replicated across all 128 lanes (edge aggregate column)
#   row  N_PAD      : we1 row  (conv1.lin_edge weight, edge_channels == 1)
#   row  N_PAD + 1  : we2 row  (conv2.lin_edge weight)
#   row  N_PAD + 2  : b_head row (node_linear bias)
ROW_WE1 = N_PAD
ROW_WE2 = N_PAD + 1
ROW_BH = N_PAD + 2


def graphnet_kernel(x_ref, ahat_ref, pool_ref, wn1_ref, wn2_ref, wh_ref,
                    slab_ref, out_ref):
    """Fused GraphNet forward (edge_pooling=False default path):
         h1  = relu(A_hat @ (x  @ Wn1) + Ae * we1_row)
         h2  = relu(A_hat @ (h1 @ Wn2) + Ae * we2_row)
         out = (P @ h2) @ W_head + b_head
    """
    a_hat = ahat_ref[...]                           # (N_PAD, N_PAD) bf16
    ae_b = slab_ref[0:N_PAD, :]                     # (N_PAD, F_PAD) f32, Ae[n] per row
    we1 = slab_ref[ROW_WE1:ROW_WE1 + 1, :]          # (1, F_PAD) f32
    we2 = slab_ref[ROW_WE2:ROW_WE2 + 1, :]          # (1, F_PAD) f32
    bh = slab_ref[ROW_BH:ROW_BH + 1, :]             # (1, F_PAD) f32

    # ---- layer 1: GCNConv(in -> hidden) + ReLU ----
    ne1 = jnp.dot(x_ref[...], wn1_ref[...], preferred_element_type=jnp.float32)
    h1 = (jnp.dot(a_hat, ne1.astype(jnp.bfloat16),
                  preferred_element_type=jnp.float32)
          + ae_b * we1)                             # VPU broadcast edge term (f32)
    h1 = jnp.maximum(h1, 0.0).astype(jnp.bfloat16)

    # ---- layer 2: GCNConv(hidden -> hidden) + ReLU (h1 stays VMEM-resident) ----
    ne2 = jnp.dot(h1, wn2_ref[...], preferred_element_type=jnp.float32)
    h2 = (jnp.dot(a_hat, ne2.astype(jnp.bfloat16),
                  preferred_element_type=jnp.float32)
          + ae_b * we2)
    h2 = jnp.maximum(h2, 0.0).astype(jnp.bfloat16)

    # ---- global_mean_pool (P is the per-graph mean matrix) + node_linear head ----
    pooled = jnp.dot(pool_ref[...], h2, preferred_element_type=jnp.float32)
    out_ref[...] = (jnp.dot(pooled.astype(jnp.bfloat16), wh_ref[...],
                            preferred_element_type=jnp.float32) + bh)

    # TODO(synk): the edge_pooling=True branch (edge_linear / concat_linear) of
    # GraphNet.forward is not implemented; the default edge_pooling=False path is.


def graphnet_forward(x_p, ahat_p, pool_p, wn1_p, wn2_p, wh_p, slab_p):
    vmem = pl.BlockSpec(memory_space=pltpu.MemorySpace.VMEM)
    return pl.pallas_call(
        graphnet_kernel,
        out_shape=jax.ShapeDtypeStruct((B_PAD, F_PAD), jnp.float32),
        in_specs=[vmem] * 7,
        out_specs=vmem,
    )(x_p, ahat_p, pool_p, wn1_p, wn2_p, wh_p, slab_p)


def build_graph_structs(edge_index, edge_attr, batch_index, num_nodes, num_graphs):
    """Self-loops + gcn_norm, then fold gather/scatter of message passing into
    dense O(N^2) / O(N) structures (no (E,N)/(N,E) matrices anywhere)."""
    src, dst = edge_index[0], edge_index[1]
    loops = jnp.arange(num_nodes, dtype=edge_index.dtype)
    src = jnp.concatenate([src, loops])
    dst = jnp.concatenate([dst, loops])
    ec = edge_attr.shape[1]
    # Self-loop edges get zero edge_attr (matches torch.cat([edge_attr, loop_attr])).
    ea_full = jnp.concatenate([edge_attr, jnp.zeros((num_nodes, ec), jnp.float32)], 0)
    E = src.shape[0]
    ones = jnp.ones((E,), jnp.float32)
    # gcn_norm: deg over target nodes, norm = D^-1/2[src] * D^-1/2[dst]
    deg = jnp.zeros((num_nodes,), jnp.float32).at[dst].add(ones)
    dinv = jnp.where(deg > 0, jax.lax.rsqrt(deg), 0.0)
    norm = dinv[src] * dinv[dst]
    # A_hat = A @ S folded directly: A_hat[d, s] += norm[e]
    a_hat = jnp.zeros((num_nodes, num_nodes), jnp.float32).at[dst, src].add(norm)
    # Ae = A @ ea_full folded directly: Ae[d] += norm[e] * ea_full[e]
    ae = jnp.zeros((num_nodes, ec), jnp.float32).at[dst].add(norm[:, None] * ea_full)
    # Per-graph mean-pool matrix P[g, i] = 1/|graph g| if batch[i] == g.
    counts = jnp.zeros((num_graphs,), jnp.float32).at[batch_index].add(1.0)
    pool = (jnp.zeros((num_graphs, num_nodes), jnp.float32)
            .at[batch_index, jnp.arange(num_nodes)].set(1.0))
    pool = pool / jnp.maximum(counts, 1.0)[:, None]
    return src, dst, norm, ea_full, a_hat, ae, pool


def pad2d(x, rows, cols):
    return jnp.pad(x, ((0, rows - x.shape[0]), (0, cols - x.shape[1])))


def linear_weight(key, fan_in, fan_out):
    # PyTorch nn.Linear default init (kaiming-uniform), stored as (in, out).
    bound = 1.0 / np.sqrt(fan_in)
    return jax.random.uniform(key, (fan_in, fan_out), jnp.float32, -bound, bound)


if __name__ == "__main__":
    # Problem sizes implied by the module: edge_index = randint(0, 4, (2, 10)).
    N = 4                  # nodes
    E0 = 10                # edges (before self-loops)
    in_channels = 3
    hidden_channels = 16
    out_channels = 2
    edge_channels = 1
    num_graphs = 1         # single graph -> batch_index all zeros

    key = jax.random.PRNGKey(0)
    k_ei, k_x, k_ea, k_w1, k_w2, k_w3, k_w4, k_head = jax.random.split(key, 8)

    edge_index = jax.random.randint(k_ei, (2, E0), 0, N, dtype=jnp.int32)
    x = jax.random.normal(k_x, (N, in_channels), jnp.float32)
    edge_attr = jax.random.normal(k_ea, (E0, edge_channels), jnp.float32)
    batch_index = jnp.zeros((N,), jnp.int32)

    wn1 = linear_weight(k_w1, in_channels, hidden_channels)       # conv1.lin_node
    we1 = linear_weight(k_w2, edge_channels, hidden_channels)     # conv1.lin_edge
    wn2 = linear_weight(k_w3, hidden_channels, hidden_channels)   # conv2.lin_node
    we2 = linear_weight(k_w4, edge_channels, hidden_channels)     # conv2.lin_edge
    k_hw, k_hb = jax.random.split(k_head)
    w_head = linear_weight(k_hw, hidden_channels, out_channels)   # node_linear.weight^T
    b_bound = 1.0 / np.sqrt(hidden_channels)
    b_head = jax.random.uniform(k_hb, (out_channels,), jnp.float32,
                                -b_bound, b_bound)                # node_linear.bias

    # Graph preprocessing glue (self-loops, symmetric normalization, folding).
    src, dst, norm, ea_full, a_hat, ae, pool = build_graph_structs(
        edge_index, edge_attr, batch_index, N, num_graphs)

    # Padding + dtype choices:
    #  - MXU operands -> bf16 (f32 accumulation inside the kernel).
    #  - Zero padding is exact through matmuls / broadcasts / ReLU; real values
    #    are sliced out afterwards.
    x_p = pad2d(x, N_PAD, F_PAD).astype(jnp.bfloat16)
    ahat_p = pad2d(a_hat, N_PAD, N_PAD).astype(jnp.bfloat16)
    pool_p = pad2d(pool, B_PAD, N_PAD).astype(jnp.bfloat16)
    wn1_p = pad2d(wn1, F_PAD, F_PAD).astype(jnp.bfloat16)
    wn2_p = pad2d(wn2, F_PAD, F_PAD).astype(jnp.bfloat16)
    wh_p = pad2d(w_head, F_PAD, F_PAD).astype(jnp.bfloat16)

    # Single packed slab for the VPU-only small operands (one DMA instead of four).
    ae_col = pad2d(ae, N_PAD, 1)                                   # (N_PAD, 1) f32
    slab_p = jnp.concatenate([
        jnp.broadcast_to(ae_col, (N_PAD, F_PAD)),                  # Ae broadcast rows
        pad2d(we1, 1, F_PAD),                                      # we1 row
        pad2d(we2, 1, F_PAD),                                      # we2 row
        pad2d(b_head[None, :], 1, F_PAD),                          # bias row
        jnp.zeros((SLAB_ROWS - N_PAD - 3, F_PAD), jnp.float32),    # tail padding
    ], axis=0)

    out_p = graphnet_forward(x_p, ahat_p, pool_p, wn1_p, wn2_p, wh_p, slab_p)
    out_p = jax.block_until_ready(out_p)
    out = np.asarray(out_p)[:num_graphs, :out_channels]

    # Silent cross-check against a scatter/gather f32 reference (PyG semantics).
    def gcn_layer_ref(h, wn, we):
        node_emb = h @ wn
        edge_emb = ea_full @ we
        msg = norm[:, None] * (node_emb[src] + edge_emb)
        return jnp.zeros((N, wn.shape[1]), jnp.float32).at[dst].add(msg)

    h_ref = jnp.maximum(gcn_layer_ref(x, wn1, we1), 0.0)
    h_ref = jnp.maximum(gcn_layer_ref(h_ref, wn2, we2), 0.0)
    cnt = jnp.zeros((num_graphs,), jnp.float32).at[batch_index].add(1.0)
    x_pool = (jnp.zeros((num_graphs, hidden_channels), jnp.float32)
              .at[batch_index].add(h_ref)) / jnp.maximum(cnt, 1.0)[:, None]
    out_ref = x_pool @ w_head + b_head

    # bf16 MXU operands -> relaxed tolerance (review note).
    np.testing.assert_allclose(out, np.asarray(out_ref), rtol=2e-2, atol=2e-2)

    print("KERNEL_OK")
</pallas_src>

<mosaic_0001>
module attributes {stable_mosaic.version = 11 : i64} {
  func.func @graphnet_kernel(%arg0: memref<8x128xbf16, #tpu.memory_space<vmem>>, %arg1: memref<8x8xbf16, #tpu.memory_space<vmem>>, %arg2: memref<8x8xbf16, #tpu.memory_space<vmem>>, %arg3: memref<128x128xbf16, #tpu.memory_space<vmem>>, %arg4: memref<128x128xbf16, #tpu.memory_space<vmem>>, %arg5: memref<128x128xbf16, #tpu.memory_space<vmem>>, %arg6: memref<16x128xf32, #tpu.memory_space<vmem>>, %arg7: memref<8x128xf32, #tpu.memory_space<vmem>>) attributes {dimension_semantics = [], scalar_prefetch = 0 : i64, scratch_operands = 0 : i64, tpu.core_type = #tpu.core_type<tc>} {
    %c0 = arith.constant 0 : index
    %c0_0 = arith.constant 0 : index
    %0 = vector.load %arg1[%c0, %c0_0] : memref<8x8xbf16, #tpu.memory_space<vmem>>, vector<8x8xbf16>
    %c0_1 = arith.constant 0 : index
    %c0_2 = arith.constant 0 : index
    %1 = vector.load %arg6[%c0_1, %c0_2] : memref<16x128xf32, #tpu.memory_space<vmem>>, vector<8x128xf32>
    %c8 = arith.constant 8 : index
    %c0_3 = arith.constant 0 : index
    %2 = vector.load %arg6[%c8, %c0_3] : memref<16x128xf32, #tpu.memory_space<vmem>>, vector<1x128xf32>
    %c9 = arith.constant 9 : index
    %c0_4 = arith.constant 0 : index
    %3 = vector.load %arg6[%c9, %c0_4] : memref<16x128xf32, #tpu.memory_space<vmem>>, vector<1x128xf32>
    %c10 = arith.constant 10 : index
    %c0_5 = arith.constant 0 : index
    %4 = vector.load %arg6[%c10, %c0_5] : memref<16x128xf32, #tpu.memory_space<vmem>>, vector<1x128xf32>
    %c0_6 = arith.constant 0 : index
    %c0_7 = arith.constant 0 : index
    %5 = vector.load %arg0[%c0_6, %c0_7] : memref<8x128xbf16, #tpu.memory_space<vmem>>, vector<8x128xbf16>
    %c0_8 = arith.constant 0 : index
    %c0_9 = arith.constant 0 : index
    %6 = vector.load %arg3[%c0_8, %c0_9] : memref<128x128xbf16, #tpu.memory_space<vmem>>, vector<128x128xbf16>
    %cst = arith.constant dense<0.000000e+00> : vector<8x128xf32>
    %7 = tpu.matmul %5, %6, %cst {dimension_numbers = #tpu.dot_dimension_numbers<[1], [0], [0], [1], [0, 0, 1, 1], [], []>} : vector<8x128xbf16>, vector<128x128xbf16>, vector<8x128xf32> -> vector<8x128xf32>
    %8 = arith.truncf %7 : vector<8x128xf32> to vector<8x128xbf16>
    %cst_10 = arith.constant dense<0.000000e+00> : vector<8x128xf32>
    %9 = tpu.matmul %0, %8, %cst_10 {dimension_numbers = #tpu.dot_dimension_numbers<[1], [0], [0], [1], [0, 0, 1, 1], [], []>} : vector<8x8xbf16>, vector<8x128xbf16>, vector<8x128xf32> -> vector<8x128xf32>
    %10 = vector.broadcast %2 : vector<1x128xf32> to vector<8x128xf32>
    %11 = arith.mulf %1, %10 : vector<8x128xf32>
    %12 = arith.addf %9, %11 : vector<8x128xf32>
    %cst_11 = arith.constant 0.000000e+00 : f32
    %13 = vector.broadcast %cst_11 : f32 to vector<8x128xf32>
    %14 = arith.maximumf %12, %13 : vector<8x128xf32>
    %15 = arith.truncf %14 : vector<8x128xf32> to vector<8x128xbf16>
    %c0_12 = arith.constant 0 : index
    %c0_13 = arith.constant 0 : index
    %16 = vector.load %arg4[%c0_12, %c0_13] : memref<128x128xbf16, #tpu.memory_space<vmem>>, vector<128x128xbf16>
    %cst_14 = arith.constant dense<0.000000e+00> : vector<8x128xf32>
    %17 = tpu.matmul %15, %16, %cst_14 {dimension_numbers = #tpu.dot_dimension_numbers<[1], [0], [0], [1], [0, 0, 1, 1], [], []>} : vector<8x128xbf16>, vector<128x128xbf16>, vector<8x128xf32> -> vector<8x128xf32>
    %18 = arith.truncf %17 : vector<8x128xf32> to vector<8x128xbf16>
    %cst_15 = arith.constant dense<0.000000e+00> : vector<8x128xf32>
    %19 = tpu.matmul %0, %18, %cst_15 {dimension_numbers = #tpu.dot_dimension_numbers<[1], [0], [0], [1], [0, 0, 1, 1], [], []>} : vector<8x8xbf16>, vector<8x128xbf16>, vector<8x128xf32> -> vector<8x128xf32>
    %20 = vector.broadcast %3 : vector<1x128xf32> to vector<8x128xf32>
    %21 = arith.mulf %1, %20 : vector<8x128xf32>
    %22 = arith.addf %19, %21 : vector<8x128xf32>
    %cst_16 = arith.constant 0.000000e+00 : f32
    %23 = vector.broadcast %cst_16 : f32 to vector<8x128xf32>
    %24 = arith.maximumf %22, %23 : vector<8x128xf32>
    %25 = arith.truncf %24 : vector<8x128xf32> to vector<8x128xbf16>
    %c0_17 = arith.constant 0 : index
    %c0_18 = arith.constant 0 : index
    %26 = vector.load %arg2[%c0_17, %c0_18] : memref<8x8xbf16, #tpu.memory_space<vmem>>, vector<8x8xbf16>
    %cst_19 = arith.constant dense<0.000000e+00> : vector<8x128xf32>
    %27 = tpu.matmul %26, %25, %cst_19 {dimension_numbers = #tpu.dot_dimension_numbers<[1], [0], [0], [1], [0, 0, 1, 1], [], []>} : vector<8x8xbf16>, vector<8x128xbf16>, vector<8x128xf32> -> vector<8x128xf32>
    %28 = arith.truncf %27 : vector<8x128xf32> to vector<8x128xbf16>
    %c0_20 = arith.constant 0 : index
    %c0_21 = arith.constant 0 : index
    %29 = vector.load %arg5[%c0_20, %c0_21] : memref<128x128xbf16, #tpu.memory_space<vmem>>, vector<128x128xbf16>
    %cst_22 = arith.constant dense<0.000000e+00> : vector<8x128xf32>
    %30 = tpu.matmul %28, %29, %cst_22 {dimension_numbers = #tpu.dot_dimension_numbers<[1], [0], [0], [1], [0, 0, 1, 1], [], []>} : vector<8x128xbf16>, vector<128x128xbf16>, vector<8x128xf32> -> vector<8x128xf32>
    %31 = vector.broadcast %4 : vector<1x128xf32> to vector<8x128xf32>
    %32 = arith.addf %30, %31 : vector<8x128xf32>
    %c0_23 = arith.constant 0 : index
    %c0_24 = arith.constant 0 : index
    %33 = vector.load %arg7[%c0_23, %c0_24] : memref<8x128xf32, #tpu.memory_space<vmem>>, vector<8x128xf32>
    tpu.vector_store %arg7[%c0_23, %c0_24], %32 {strides = array<i32>} : memref<8x128xf32, #tpu.memory_space<vmem>>, vector<8x128xf32>,
    return
  }
}

</mosaic_0001>

<bundles_post_ra>
// kernel: tpu_custom_call.1
= control target key start
LH: loop header
LB: loop body
LE: loop exit
PB: predicated region body
PF: predicated region fallthrough
CT: control target
= control target key end

     0   :  { %12 = vsyncpa [#allocation3], 0  ;;  %s889_s0 = inlined_call_operand.hbm [shape: bf16[8,128], index: 0, kind: input, shape index: {}]   ;;  %s890_s1 = inlined_call_operand.hbm [shape: bf16[8,8], index: 1, kind: input, shape index: {}]   ;;  %s891_s2 = inlined_call_operand.hbm [shape: bf16[8,8], index: 2, kind: input, shape index: {}]   ;;  %s892_s3 = inlined_call_operand.hbm [shape: bf16[128,128], index: 3, kind: input, shape index: {}]   ;;  %s893_s4 = inlined_call_operand.hbm [shape: bf16[128,128], index: 4, kind: input, shape index: {}]   ;;  %s894_s5 = inlined_call_operand.hbm [shape: bf16[128,128], index: 5, kind: input, shape index: {}]   ;;  %s895_s6 = inlined_call_operand.hbm [shape: f32[16,128], index: 6, kind: input, shape index: {}]   ;;  %s896_s7 = inlined_call_operand.hbm [shape: f32[8,128], index: 7, kind: output, shape index: {}]  }
   0x1   :  { %13 = vsyncpa [#allocation6], 0 }
   0x2   :  { %14 = vsyncpa [#allocation9], 0 }
   0x3   :  { %15 = vsyncpa [#allocation12], 0  ;;  %s33_s26 = sshll.u32 %s890_s1, 4  ;;  %s34_s26 = int_to_ptr.hbm [resolvable:$true] %s33_s26 }
   0x4   :  { %16 = vsyncpa [#allocation4], 0  ;;  %s798_s27 = smov [#allocation5]   ;;  %s54_s8 = sshll.u32 %s892_s3, 4  ;;  %s55_s8 = int_to_ptr.hbm [resolvable:$true] %s54_s8 }
   0x5   :  { %s35_s28 = sshll.u32 %s798_s27, 4  ;;  %s799_s9 = smov [#allocation8]   ;;  %s36_s28 = int_to_ptr.vmem [resolvable:$true] %s35_s28 }
   0x6   :  { %38 = dma.hbm_to_vmem [thread:$0]  %s34_s26, 64, %s36_s28, [#allocation6]  }
   0x7   :  { %s56_s10 = sshll.u32 %s799_s9, 4  ;;  %s800_s11 = smov 64   ;;  %s57_s10 = int_to_ptr.vmem [resolvable:$true] %s56_s10 }
   0x8   :  { %s801_s12 = smov 4   ;;  %s80_s14 = sshll.u32 %s894_s5, 4  ;;  %s81_s14 = int_to_ptr.hbm [resolvable:$true] %s80_s14 }
   0x9   :  { %62 = dma.hbm_to_vmem [thread:$0]  %s55_s8, 1024, %s57_s10, [#allocation9], %s800_s11, %s800_s11, %s801_s12  }
   0xa   :  { %s802_s15 = smov [#allocation11]   ;;  %s22_s18 = sshll.u32 %s889_s0, 4  ;;  %s23_s18 = int_to_ptr.hbm [resolvable:$true] %s22_s18 }
   0xb   :  { %s82_s16 = sshll.u32 %s802_s15, 4  ;;  %s803_s19 = smov [#allocation2]   ;;  %s83_s16 = int_to_ptr.vmem [resolvable:$true] %s82_s16 }
   0xc   :  { %88 = dma.hbm_to_vmem [thread:$0]  %s81_s14, 1024, %s83_s16, [#allocation12], %s800_s11, %s800_s11, %s801_s12  }
   0xd   :  { %s24_s20 = sshll.u32 %s803_s19, 4  ;;  %s44_s23 = sshll.u32 %s891_s2, 4  ;;  %s25_s20 = int_to_ptr.vmem [resolvable:$true] %s24_s20  ;;  %s45_s23 = int_to_ptr.hbm [resolvable:$true] %s44_s23 }
   0xe   :  { %27 = dma.hbm_to_vmem [thread:$0]  %s23_s18, 64, %s25_s20, [#allocation3]  }
   0xf   :  { %s67_s25 = sshll.u32 %s893_s4, 4  ;;  %s804_s26 = smov [#allocation7]   ;;  %s68_s25 = int_to_ptr.hbm [resolvable:$true] %s67_s25 }
  0x10   :  { %s46_s0 = sshll.u32 %s804_s26, 4  ;;  %s805_s27 = smov [#allocation10]   ;;  %s47_s0 = int_to_ptr.vmem [resolvable:$true] %s46_s0 }
  0x11   :  { %49 = dma.hbm_to_vmem [thread:$0]  %s45_s23, 64, %s47_s0, [#allocation6]  }
  0x12   :  { %s69_s28 = sshll.u32 %s805_s27, 4  ;;  %s93_s8 = sshll.u32 %s895_s6, 4  ;;  %s70_s28 = int_to_ptr.vmem [resolvable:$true] %s69_s28  ;;  %s94_s8 = int_to_ptr.hbm [resolvable:$true] %s93_s8 }
  0x13   :  { %75 = dma.hbm_to_vmem [thread:$0]  %s68_s25, 1024, %s70_s28, [#allocation9], %s800_s11, %s800_s11, %s801_s12  }
  0x14   :  { %s806_s2 = smov [#allocation13]   ;;  %s807_s4 = smov 128  }
  0x15   :  { %s95_s9 = sshll.u32 %s806_s2, 4  ;;  %s808_s10 = smov 8   ;;  %s96_s9 = int_to_ptr.vmem [resolvable:$true] %s95_s9 }
  0x16   :  { %101 = dma.hbm_to_vmem [thread:$0]  %s94_s8, 256, %s96_s9, [#allocation12], %s807_s4, %s807_s4, %s808_s10  }
  0x17   :  { %788 = dma.done.wait [#allocation3], 64  }
  0x18   :  { %789 = vsyncadd [#allocation3], 4294967232 }
  0x19   :  { %790 = dma.done.wait [#allocation6], 128  }
  0x1a   :  { %791 = vsyncadd [#allocation6], 4294967168 }
  0x1b   :  { %792 = dma.done.wait [#allocation9], 2048  }
  0x1c   :  { %793 = vsyncadd [#allocation9], 4294965248 }
  0x1d   :  { %794 = dma.done.wait [#allocation12], 1280  }
  0x1e   :  { %795 = vsyncadd [#allocation12], 4294966016  ;;  %v564_v0 = vld [vmem:[#allocation8 + $0x38] sm:$0xff]  ;;  %v563_v1 = vld [vmem:[#allocation8 + $0x30] sm:$0xff]  ;;  %vm221_vm0 = vcmask 1043456   ;;  %vm217_vm1 = vcmask 64512  }
  0x1f   :  { %201 = vmatpush.bf16.msra.mxu0 %v564_v0  ;;  %v562_v2 = vld [vmem:[#allocation8 + $0x28] sm:$0xff]  ;;  %v561_v3 = vld [vmem:[#allocation8 + $0x20] sm:$0xff]  ;;  %v560_v4 = vld [vmem:[#allocation8 + $0x18] sm:$0xff]  ;;  %s809_s6 = smov [#allocation14]   ;;  %s445_s13 = sshll.u32 %s896_s7, 4  ;;  %s446_s13 = int_to_ptr.hbm [resolvable:$true] %s445_s13 }
  0x20   :  { %v559_v5 = vld [vmem:[#allocation8 + $0x10] sm:$0xff]  ;;  %v558_v6 = vld [vmem:[#allocation8 + $0x8] sm:$0xff]  ;;  %v557_v7 = vld [vmem:[#allocation8] sm:$0xff]  ;;  %s443_s11 = sshll.u32 %s809_s6, 4  ;;  %s444_s11 = int_to_ptr.vmem [resolvable:$true] %s443_s11 }
  0x21   :  { %v136_v8 = vld [vmem:[#allocation2] sm:$0xf]  ;;  %v572_v9 = vld [vmem:[#allocation10 + $0x38] sm:$0xff]  ;;  %v570_v11 = vld [vmem:[#allocation10 + $0x28] sm:$0xff] }
  0x22   :  { %304 = vmatpush.bf16.msra.mxu2 %v572_v9  ;;  %v571_v10 = vld [vmem:[#allocation10 + $0x30] sm:$0xff]  ;;  %v569_v12 = vld [vmem:[#allocation10 + $0x20] sm:$0xff]  ;;  %v568_v13 = vld [vmem:[#allocation10 + $0x18] sm:$0xff] }
  0x23   :  { %202 = vmatpush.bf16.msra.mxu0 %v563_v1  ;;  %v567_v14 = vld [vmem:[#allocation10 + $0x10] sm:$0xff]  ;;  %v131_v18 = vld [vmem:[#allocation5] sm:$0xf]  ;;  %v566_v20 = vld [vmem:[#allocation10 + $0x8] sm:$0xff] }
  0x24   :  { %v565_v21 = vld [vmem:[#allocation10] sm:$0xff]  ;;  %v593_v22 = vld [vmem:[#allocation13 + $0x8] ss:$0 sm:$0xff]  ;;  %v580_v34 = vld [vmem:[#allocation11 + $0x38] sm:$0xff] }
  0x25   :  { %v132_v23 = vld [vmem:[#allocation13] sm:$0xff]  ;;  %v579_v35 = vld [vmem:[#allocation11 + $0x30] sm:$0xff]  ;;  %v578_v36 = vld [vmem:[#allocation11 + $0x28] sm:$0xff] }
  0x26   :  { %305 = vmatpush.bf16.msra.mxu2 %v571_v10  ;;  %v216_v24 = vmul.f32 %v593_v22, %v132_v23  ;;  %v577_v37 = vld [vmem:[#allocation11 + $0x20] sm:$0xff]  ;;  %v594_v38 = vld [vmem:[#allocation13 + $0x9] ss:$0 sm:$0xff]  ;;  %v576_v39 = vld [vmem:[#allocation11 + $0x18] sm:$0xff] }
  0x27   :  { %203 = vmatpush.bf16.msra.mxu0 %v562_v2  ;;  %v319_v40 = vmul.f32 %v594_v38, %v132_v23  ;;  %v575_v41 = vld [vmem:[#allocation11 + $0x10] sm:$0xff]  ;;  %v574_v44 = vld [vmem:[#allocation11 + $0x8] sm:$0xff]  ;;  %v338_v49 = vld [vmem:[#allocation7] sm:$0xf] }
  0x28   :  { %v573_v50 = vld [vmem:[#allocation11] sm:$0xff]  ;;  %v595_v54 = vld [vmem:[#allocation13 + $0xa] ss:$0 sm:$0xff] }
  0x2a   :  { %306 = vmatpush.bf16.msra.mxu2 %v570_v11 }
  0x2b   :  { %204 = vmatpush.bf16.msra.mxu0 %v561_v3 }
  0x2e   :  { %307 = vmatpush.bf16.msra.mxu2 %v569_v12 }
  0x2f   :  { %205 = vmatpush.bf16.msra.mxu0 %v560_v4 }
  0x32   :  { %308 = vmatpush.bf16.msra.mxu2 %v568_v13 }
  0x33   :  { %206 = vmatpush.bf16.msra.mxu0 %v559_v5 }
  0x36   :  { %309 = vmatpush.bf16.msra.mxu2 %v567_v14 }
  0x37   :  { %207 = vmatpush.bf16.msra.mxu0 %v558_v6 }
  0x3a   :  { %310 = vmatpush.bf16.msra.mxu2 %v566_v20 }
  0x3b   :  { %208 = vmatpush.bf16.msra.mxu0 %v557_v7 }
  0x3e   :  { %209 = vmatmul.bf16.vlgmr.msra.gmra.mxu0 %v136_v8  ;;  %311 = vmatpush.bf16.msra.mxu2 %v565_v21 }
  0xbb   :  { %v210_v15 = vpop.f32.mrf.mxu0 }
  0xbc   :  { %v214_v16 = vpack.c.bf16 %v210_v15, %v210_v15 }
  0xbe   :  { %v223_v17 = vsel %vm221_vm0, %v214_v16, 0 }
  0xbf   :  { %232 = vmatpush.bf16.msra.mxu1 %v223_v17 }
  0xc2   :  { %490 = vmatmul.msk.bf16.vlgmr.msra.gmra.mxu1 %vm217_vm1, %v131_v18 }
  0xc3   :  { %v212_v19 = vpop.f32.mrf.mxu0 }
 0x13f   :  { %v234_v25 = vpop.f32.mrf.mxu1 }
 0x140   :  { %v235_v26 = vadd.f32 %v234_v25, %v216_v24 }
 0x142   :  { %v238_v27 = vmax.f32 %v235_v26, 0.0 }
 0x144   :  { %v239_v28 = vpack.c.bf16 %v238_v27, %v238_v27 }
 0x146   :  { %312 = vmatmul.bf16.vlgmr.msra.gmra.mxu2 %v239_v28 }
 0x147   :  { %v236_v29 = vpop.f32.mrf.mxu1 }
 0x1c9   :  { %v313_v30 = vpop.f32.mrf.mxu2 }
 0x1ca   :  { %v317_v31 = vpack.c.bf16 %v313_v30, %v313_v30 }
 0x1cc   :  { %v321_v32 = vsel %vm221_vm0, %v317_v31, 0 }
 0x1cd   :  { %330 = vmatpush.bf16.msra.mxu3 %v321_v32 }
 0x1d0   :  { %523 = vmatmul.msk.bf16.vlgmr.msra.gmra.mxu3 %vm217_vm1, %v131_v18 }
 0x1d1   :  { %v315_v33 = vpop.f32.mrf.mxu2  ;;  %424 = vmatpush.bf16.msrb.mxu3 %v580_v34 }
 0x1d5   :  { %425 = vmatpush.bf16.msrb.mxu3 %v579_v35 }
 0x1d9   :  { %426 = vmatpush.bf16.msrb.mxu3 %v578_v36 }
 0x1dd   :  { %427 = vmatpush.bf16.msrb.mxu3 %v577_v37 }
 0x1e1   :  { %428 = vmatpush.bf16.msrb.mxu3 %v576_v39 }
 0x1e5   :  { %429 = vmatpush.bf16.msrb.mxu3 %v575_v41 }
 0x1e9   :  { %430 = vmatpush.bf16.msrb.mxu3 %v574_v44 }
 0x1ed   :  { %431 = vmatpush.bf16.msrb.mxu3 %v573_v50 }
 0x253   :  { %v332_v42 = vpop.f32.mrf.mxu3 }
 0x254   :  { %v333_v43 = vadd.f32 %v332_v42, %v319_v40 }
 0x256   :  { %v336_v45 = vmax.f32 %v333_v43, 0.0 }
 0x258   :  { %v337_v46 = vpack.c.bf16 %v336_v45, %v336_v45 }
 0x25a   :  { %v343_v47 = vsel %vm221_vm0, %v337_v46, 0 }
 0x25b   :  { %v334_v48 = vpop.f32.mrf.mxu3  ;;  %352 = vmatpush.bf16.msrb.mxu1 %v343_v47 }
 0x25e   :  { %524 = vmatmul.msk.bf16.vlgmr.msrb.gmra.mxu1 %vm217_vm1, %v338_v49 }
 0x2db   :  { %v354_v51 = vpop.f32.mrf.mxu1 }
 0x2dc   :  { %v358_v52 = vpack.c.bf16 %v354_v51, %v354_v51 }
 0x2de   :  { %432 = vmatmul.bf16.vlgmr.msrb.gmra.mxu3 %v358_v52 }
 0x2e3   :  { %v356_v53 = vpop.f32.mrf.mxu1 }
 0x361   :  { %v433_v55 = vpop.f32.mrf.mxu3 }
 0x362   :  { %v434_v56 = vadd.f32 %v595_v54, %v433_v55 }
 0x364   :  { %437 = vst [vmem:[#allocation14] sm:$0xff] %v434_v56 }
 0x365   :  { %448 = dma.vmem_to_hbm [thread:$0]  %s444_s11, 128, %s446_s13, [#allocation4]  }
 0x369   :  { %v435_v57 = vpop.f32.mrf.mxu3 }
 0x36a   :  { %796 = dma.done.wait [#allocation4], 128  }
 0x36b   :  { %797 = vsyncadd [#allocation4], 4294967168 }
 0x36c   :  { %453 = vsyncpa [#allocation3], 1 }
 0x36d   :  { %454 = vsyncpa [#allocation6], 1 }
 0x36e   :  { %455 = vsyncpa [#allocation9], 1 }
 0x36f   :  { %456 = vsyncpa [#allocation12], 1 }
 0x370   :  { %457 = vsyncpa [#allocation4], 1 }

</bundles_post_ra>
